<compile_context>
chip_gen: v6e
topology: v6e:2x2x1
jax: 0.10.0
libtpu: 0.0.40
codegen_flags: <defaults>
</compile_context>

<pallas_src>
import functools

import jax
import jax.numpy as jnp
from jax.experimental import pallas as pl
from jax.experimental.pallas import tpu as pltpu


def _round_up(x, m):
    return (x + m - 1) // m * m


# --------------------------------------------------------------------------
# Pallas kernel: one M-tile of  patches @ W + b
# --------------------------------------------------------------------------
def _patch_proj_kernel(x_ref, w_ref, b_ref, o_ref):
    # x_ref: (TILE_M, K) bf16   flattened patches (this grid step's rows)
    # w_ref: (K, N)      bf16   grid-resident projection weight
    # b_ref: (1, N)      f32    grid-resident bias
    # o_ref: (TILE_M, N) f32
    acc = jnp.dot(x_ref[...], w_ref[...], preferred_element_type=jnp.float32)
    o_ref[...] = (acc + b_ref[...]).astype(o_ref.dtype)


def _pick_tile_m(M, K, N, *, in_bytes=2, out_bytes=4,
                 budget=24 * 1024 * 1024):
    """Largest M tile whose double-buffered working set fits the VMEM budget
    and whose M-padding waste stays <= M/8 (falls back to the smallest
    budget-fitting candidate to minimize waste)."""
    if M <= 128:
        # Small problem: single tile, rounded up to the 8-sublane rule.
        return max(8, _round_up(M, 8))
    resident = 2 * K * N * in_bytes + 2 * N * 4          # weight + bias (x2 buf)
    fitting = []
    for cand in (8192, 4096, 2048, 1024, 512, 256, 128):
        per_step = 2 * cand * K * in_bytes + 2 * cand * N * out_bytes
        if resident + per_step <= budget:
            fitting.append(cand)
    if not fitting:
        return 128
    for cand in fitting:                                  # largest first
        if (_round_up(M, cand) - M) * 8 <= M:
            return cand
    return fitting[-1]                                    # smallest fitting


def _patch_proj(patches, weight_kn, bias_1n, tile_m):
    M_pad, K = patches.shape
    _, N = weight_kn.shape
    grid = (M_pad // tile_m,)

    cost = pl.CostEstimate(
        flops=2 * M_pad * K * N,
        transcendentals=0,
        bytes_accessed=(M_pad * K * patches.dtype.itemsize
                        + K * N * weight_kn.dtype.itemsize
                        + N * bias_1n.dtype.itemsize
                        + M_pad * N * 4),
    )

    return pl.pallas_call(
        _patch_proj_kernel,
        out_shape=jax.ShapeDtypeStruct((M_pad, N), jnp.float32),
        grid_spec=pltpu.PrefetchScalarGridSpec(
            num_scalar_prefetch=0,
            grid=grid,
            in_specs=[
                pl.BlockSpec((tile_m, K), lambda i: (i, 0)),
                pl.BlockSpec((K, N), lambda i: (0, 0)),    # resident weight
                pl.BlockSpec((1, N), lambda i: (0, 0)),    # resident bias
            ],
            out_specs=pl.BlockSpec((tile_m, N), lambda i: (i, 0)),
        ),
        compiler_params=pltpu.CompilerParams(
            dimension_semantics=("parallel",),
            vmem_limit_bytes=32 * 1024 * 1024,
        ),
        cost_estimate=cost,
    )(patches, weight_kn, bias_1n)


# --------------------------------------------------------------------------
# patchEmbed forward (layout glue in plain JAX, GEMM in Pallas)
# --------------------------------------------------------------------------
@functools.partial(jax.jit, static_argnames=("patch_size",))
def patch_embed_forward(x, weight, bias, *, patch_size=4):
    """
    x:      (B, C, H, W)  float32  (NCHW, PyTorch convention)
    weight: (embed_dim, C, p, p)   (PyTorch Conv2d weight layout)
    bias:   (embed_dim,)
    returns (out, Hp, Wp) with out: (B, Hp*Wp, embed_dim) float32
    """
    p = patch_size
    B, C, H, W = x.shape
    embed_dim = weight.shape[0]

    # bf16 up front: halves HBM traffic of the patchification pass and feeds
    # the MXU its native dtype (accumulation stays f32 inside the kernel).
    x = x.astype(jnp.bfloat16)
    w = weight.astype(jnp.bfloat16)

    # F.pad(x, (0, pad_w, 0, pad_h, 0, 0)) — pad right/bottom so H, W % p == 0
    pad_h = (-H) % p
    pad_w = (-W) % p
    if pad_h or pad_w:
        x = jnp.pad(x, ((0, 0), (0, 0), (0, pad_h), (0, pad_w)))
    Hp, Wp = (H + pad_h) // p, (W + pad_w) // p

    # Rearrange into flattened patches: (B*Hp*Wp, C*p*p), flattened (c, kh, kw)
    # order to match PyTorch's Conv2d weight layout.
    # TODO(synk): fold this patchification transpose into the pallas_call
    # (grid over (B, Hp-blocks) with in-kernel rearrangement of NCHW tiles) to
    # avoid materializing one extra HBM copy of the activation.
    xp = x.reshape(B, C, Hp, p, Wp, p)
    xp = jnp.transpose(xp, (0, 2, 4, 1, 3, 5))            # (B, Hp, Wp, C, p, p)
    patches = xp.reshape(B * Hp * Wp, C * p * p)

    M, K, N = B * Hp * Wp, C * p * p, embed_dim
    tile_m = _pick_tile_m(M, K, N)
    M_pad = _round_up(M, tile_m)
    if M_pad != M:
        patches = jnp.pad(patches, ((0, M_pad - M), (0, 0)))

    w_kn = w.reshape(embed_dim, K).T                      # (K, N), (c,kh,kw) order
    b_1n = bias.astype(jnp.float32).reshape(1, N)

    out = _patch_proj(patches, w_kn, b_1n, tile_m)        # (M_pad, N) f32
    out = out[:M].reshape(B, Hp * Wp, embed_dim)          # == flatten(2).transpose(1,2)
    # norm_layer=None -> nn.Identity()
    return out, Hp, Wp


# --------------------------------------------------------------------------
# Demo / smoke test
# --------------------------------------------------------------------------
if __name__ == "__main__":
    key = jax.random.PRNGKey(0)
    k_x, k_w, k_b, k_x2 = jax.random.split(key, 4)

    patch_size = 4
    C = 3
    embed_dim = 96

    # Deterministic parameter init (synthetic — not a checkpoint load).
    fan_in = C * patch_size * patch_size
    bound = 1.0 / (fan_in ** 0.5)
    weight = jax.random.uniform(
        k_w, (embed_dim, C, patch_size, patch_size),
        minval=-bound, maxval=bound, dtype=jnp.float32)
    bias = jax.random.uniform(
        k_b, (embed_dim,), minval=-bound, maxval=bound, dtype=jnp.float32)

    def reference(x, p):
        """XLA conv reference with the same bf16-in / f32-accumulate path."""
        B = x.shape[0]
        pad_h = (-x.shape[2]) % p
        pad_w = (-x.shape[3]) % p
        xpad = jnp.pad(x, ((0, 0), (0, 0), (0, pad_h), (0, pad_w)))
        r = jax.lax.conv_general_dilated(
            xpad.astype(jnp.bfloat16), weight.astype(jnp.bfloat16),
            window_strides=(p, p), padding="VALID",
            dimension_numbers=("NCHW", "OIHW", "NCHW"),
            preferred_element_type=jnp.float32)
        Hp, Wp = r.shape[2], r.shape[3]
        r = r.reshape(B, embed_dim, Hp * Wp).transpose(0, 2, 1)
        return r + bias[None, None, :], Hp, Wp

    # Case 1: spatial dims divisible by patch size (no internal pad path).
    x1 = jax.random.normal(k_x, (2, C, 16, 16), dtype=jnp.float32)
    out1, Hp1, Wp1 = patch_embed_forward(x1, weight, bias, patch_size=patch_size)
    out1 = jax.block_until_ready(out1)
    ref1, rHp1, rWp1 = reference(x1, patch_size)
    assert (Hp1, Wp1) == (rHp1, rWp1) == (4, 4)
    assert out1.shape == (2, Hp1 * Wp1, embed_dim)
    assert jnp.allclose(out1, ref1, atol=2e-3, rtol=2e-3)

    # Case 2: non-divisible spatial dims (exercises the right/bottom F.pad
    # path and the ragged-M padding path).
    x2 = jax.random.normal(k_x2, (2, C, 18, 18), dtype=jnp.float32)
    out2, Hp2, Wp2 = patch_embed_forward(x2, weight, bias, patch_size=patch_size)
    out2 = jax.block_until_ready(out2)
    ref2, rHp2, rWp2 = reference(x2, patch_size)
    assert (Hp2, Wp2) == (rHp2, rWp2) == (5, 5)
    assert out2.shape == (2, Hp2 * Wp2, embed_dim)
    assert jnp.allclose(out2, ref2, atol=2e-3, rtol=2e-3)

    print("KERNEL_OK")
</pallas_src>

<mosaic_0001>
module attributes {stable_mosaic.version = 11 : i64} {
  func.func @_patch_proj_kernel(%arg0: i32, %arg1: memref<32x48xbf16, #tpu.memory_space<vmem>>, %arg2: memref<48x96xbf16, #tpu.memory_space<vmem>>, %arg3: memref<1x96xf32, #tpu.memory_space<vmem>>, %arg4: memref<32x96xf32, #tpu.memory_space<vmem>>) attributes {dimension_semantics = [#tpu.dimension_semantics<parallel>], iteration_bounds = array<i64: 1>, scalar_prefetch = 0 : i64, scratch_operands = 0 : i64, tpu.core_type = #tpu.core_type<tc>, window_params = [{transform_indices = @transform_0, window_bounds = array<i64: 32, 48>}, {pipeline_mode = #tpu.pipeline_mode<synchronous>, transform_indices = @transform_1, window_bounds = array<i64: 48, 96>}, {pipeline_mode = #tpu.pipeline_mode<synchronous>, transform_indices = @transform_2, window_bounds = array<i64: 1, 96>}, {transform_indices = @transform_3, window_bounds = array<i64: 32, 96>}]} {
    %c0 = arith.constant 0 : index
    %c0_0 = arith.constant 0 : index
    %0 = vector.load %arg1[%c0, %c0_0] : memref<32x48xbf16, #tpu.memory_space<vmem>>, vector<32x48xbf16>
    %c0_1 = arith.constant 0 : index
    %c0_2 = arith.constant 0 : index
    %1 = vector.load %arg2[%c0_1, %c0_2] : memref<48x96xbf16, #tpu.memory_space<vmem>>, vector<48x96xbf16>
    %cst = arith.constant dense<0.000000e+00> : vector<32x96xf32>
    %2 = tpu.matmul %0, %1, %cst {dimension_numbers = #tpu.dot_dimension_numbers<[1], [0], [0], [1], [0, 0, 1, 1], [], []>} : vector<32x48xbf16>, vector<48x96xbf16>, vector<32x96xf32> -> vector<32x96xf32>
    %c0_3 = arith.constant 0 : index
    %c0_4 = arith.constant 0 : index
    %3 = vector.load %arg3[%c0_3, %c0_4] : memref<1x96xf32, #tpu.memory_space<vmem>>, vector<1x96xf32>
    %4 = vector.broadcast %3 : vector<1x96xf32> to vector<32x96xf32>
    %5 = arith.addf %2, %4 : vector<32x96xf32>
    %c0_5 = arith.constant 0 : index
    %c0_6 = arith.constant 0 : index
    %6 = vector.load %arg4[%c0_5, %c0_6] : memref<32x96xf32, #tpu.memory_space<vmem>>, vector<32x96xf32>
    tpu.vector_store %arg4[%c0_5, %c0_6], %5 {strides = array<i32>} : memref<32x96xf32, #tpu.memory_space<vmem>>, vector<32x96xf32>,
    return
  }
  func.func @transform_0(%arg0: i32) -> (i32, i32) {
    %c0_i32 = arith.constant 0 : i32
    %c0_i32_0 = arith.constant 0 : i32
    return %arg0, %c0_i32 : i32, i32
  }
  func.func @transform_1(%arg0: i32) -> (i32, i32) {
    %c0_i32 = arith.constant 0 : i32
    %c0_i32_0 = arith.constant 0 : i32
    %c0_i32_1 = arith.constant 0 : i32
    return %c0_i32, %c0_i32_0 : i32, i32
  }
  func.func @transform_2(%arg0: i32) -> (i32, i32) {
    %c0_i32 = arith.constant 0 : i32
    %c0_i32_0 = arith.constant 0 : i32
    %c0_i32_1 = arith.constant 0 : i32
    return %c0_i32, %c0_i32_0 : i32, i32
  }
  func.func @transform_3(%arg0: i32) -> (i32, i32) {
    %c0_i32 = arith.constant 0 : i32
    %c0_i32_0 = arith.constant 0 : i32
    return %arg0, %c0_i32 : i32, i32
  }
}

</mosaic_0001>

<bundles_post_ra>
// kernel: patch_embed_forward.1
= control target key start
LH: loop header
LB: loop body
LE: loop exit
PB: predicated region body
PF: predicated region fallthrough
CT: control target
= control target key end

     0   :  { %vm61_vm0 = vcmask 392192   ;;  %s235_s0 = inlined_call_operand.vmem [shape: bf16[32,48], index: 0, kind: input, shape index: {}]   ;;  %s236_s1 = inlined_call_operand.vmem [shape: bf16[48,96], index: 1, kind: input, shape index: {}]   ;;  %s237_s2 = inlined_call_operand.vmem [shape: f32[1,96], index: 2, kind: input, shape index: {}]   ;;  %s238_s3 = inlined_call_operand.hbm [shape: f32[32,96], index: 3, kind: output, shape index: {}]  }
   0x1   :  { %v164_v0 = vld [vmem:[%s236_s1 + $0x10] sm:$0xff]   ;;  %v165_v1 = vld [vmem:[%s236_s1 + $0x8] sm:$0xff]   ;;  %v167_v2 = vld [vmem:[%s235_s0] sm:$0xff]  }
   0x2   :  { %151 = vmatprep.subr.bf16.mxu0 %v164_v0  ;;  %v166_v3 = vld [vmem:[%s236_s1] sm:$0xff]   ;;  %157 = vmatprep.mubr.msk.bf16.mxu0 %vm61_vm0, %v167_v2 }
   0x3   :  { %152 = vmatpush3.bf16.msra.mxu0 %v164_v0 }
   0x4   :  { %153 = vmatprep.subr.bf16.mxu0 %v165_v1 }
   0x5   :  { %8 = vsyncpa [#allocation3], 0  ;;  %v168_v4 = vld [vmem:[%s235_s0 + $0x8] sm:$0xff]   ;;  %v138_v5 = vld [vmem:[%s237_s2] ss:$0 sm:$0xff]  ;;  %vm117_vm1 = vcmask 785408  }
   0x6   :  { %s191_s1 = smov [#allocation2]  }
   0x7   :  { %154 = vmatpush3.bf16.msra.mxu0 %v165_v1  ;;  %s127_s24 = sshll.u32 %s191_s1, 4  ;;  %s128_s24 = int_to_ptr.vmem [resolvable:$true] %s127_s24 }
   0x8   :  { %155 = vmatprep.subr.bf16.mxu0 %v166_v3  ;;  %s169_s0 = scalar_lea.vmem %s128_s24, 512  ;;  %p174_p1 = scmp.lt.s32.totalorder %s128_s24, %s128_s24 }
   0x9   :  { %p170_p0 = scmp.ne.s32.totalorder %s128_s24, %s169_s0  ;;  %p175_p2 = scmp.lt.s32.totalorder %s169_s0, %s169_s0 }
   0xb   :  { %156 = vmatpush3.bf16.msra.mxu0 %v166_v3  ;;  %p176_p3 = por %p175_p2, %p174_p1 }
   0xd   :  { %p177_p4 = pnand %p176_p3, %p170_p0 }
   0xe   :  { %158 = vmatmul.mubr.msk.bf16.vlgmr.msra.gmra.mxu0 %vm61_vm0, %v168_v4 }
  0xce   :  { %v159_v6 = vpop.f32.mrf.mxu0 }
  0xcf   :  { %v111_v7 = vadd.f32 %v159_v6, %v138_v5 }
  0xd0   :  { %v102_v8 = vpop.f32.mrf.mxu0 }
  0xd1   :  { %120 = vst.msk [vmem:[#allocation2 + $0x10] sm:$0xff] %vm117_vm1, %v111_v7  ;;  %v103_v9 = vadd.f32 %v138_v5, %v102_v8 }
  0xd2   :  { %v160_v10 = vpop.f32.mrf.mxu0 }
  0xd3   :  { %118 = vst.msk [vmem:[#allocation2] sm:$0xff] %vm117_vm1, %v103_v9  ;;  %v114_v11 = vadd.f32 %v160_v10, %v138_v5 }
  0xd4   :  { %v105_v12 = vpop.f32.mrf.mxu0 }
  0xd5   :  { %121 = vst.msk [vmem:[#allocation2 + $0x18] sm:$0xff] %vm117_vm1, %v114_v11  ;;  %v106_v13 = vadd.f32 %v138_v5, %v105_v12 }
  0xd7   :  { %119 = vst.msk [vmem:[#allocation2 + $0x8] sm:$0xff] %vm117_vm1, %v106_v13 }
  0xd8   :  { %180 = shalt.err (!%p177_p4)
}
  0xd9   :  { %s192_s2 = smov 128   ;;  %s193_s25 = smov 8  }
  0xda   :  { %133 = dma.vmem_to_hbm [thread:$0]  %s128_s24, 512, %s238_s3, [#allocation3], %s192_s2, %s192_s2, %s193_s25  }
  0xdb   :  { %189 = dma.done.wait [#allocation3], 512  }
  0xdc   :  { %190 = vsyncadd [#allocation3], 4294966784 }
  0xdd   :  { %137 = vsyncpa [#allocation3], 1 }

</bundles_post_ra>
